<compile_context>
chip_gen: v5e
topology: v5e:2x2
jax: 0.10.0
libtpu: 0.0.40
codegen_flags: <defaults>
</compile_context>

<pallas_src>
import math
import jax
import jax.numpy as jnp
from jax.experimental import pallas as pl
from jax.experimental.pallas import tpu as pltpu

OBS_DIM = 4            # env.obs_space (synthetic stand-in for vehEnv)
ACT_DIM = 5            # env.action_space
HIDDEN = 128
PAD = 128              # lane-dense Q width (>= ACT_DIM); one full lane tile
NEG_POISON = -1e30     # baked into padded b3 lanes -> argmax needs no masking
MAX_SINGLE_TILE = 1024 # one grid step up to this many rows (v5e/v6e advice)
BIG_TM = 512           # tile size for large replay batches (v6e advice)


def dqn_kernel(x_ref, w1_ref, b1_ref, w2_ref, b2_ref, w3_ref, b3_ref,
               q_ref, a_ref):
    # ---- Layer 1: Linear(OBS_DIM -> HIDDEN) + ReLU -------------------------
    # x arrives unpadded (TM, OBS_DIM); with K=4 this is cheaper as 4 broadcast
    # FMAs on the VPU than as an MXU pass over a zero-padded K=128 contraction.
    x = x_ref[...]                                   # (TM, OBS_DIM) f32
    w1 = w1_ref[...].astype(jnp.float32)             # (OBS_DIM, HIDDEN)
    h1 = b1_ref[...]                                 # (1, HIDDEN); broadcasts over rows
    for k in range(OBS_DIM):                         # trace-time unrolled, 4 FMAs
        h1 = h1 + x[:, k:k + 1] * w1[k:k + 1, :]
    h1 = jnp.maximum(h1, 0.0).astype(jnp.bfloat16)

    # ---- Layer 2: Linear(HIDDEN -> HIDDEN) + ReLU (bf16 MXU, f32 accum) -----
    h2 = jnp.dot(h1, w2_ref[...], preferred_element_type=jnp.float32)
    h2 = jnp.maximum(h2 + b2_ref[...], 0.0).astype(jnp.bfloat16)

    # ---- Layer 3: Linear(HIDDEN -> ACT_DIM), lane-dense 128-wide output -----
    # Padded output columns have w3 = 0 and b3 = NEG_POISON, so they can never
    # win the argmax below and the consumer simply ignores them.
    q = jnp.dot(h2, w3_ref[...], preferred_element_type=jnp.float32) + b3_ref[...]
    q_ref[...] = q

    # ---- Fused greedy action (DQN.act, epsilon = 0 path) --------------------
    # Slim epilogue: no iota/validity mask needed thanks to the poisoned bias
    # lanes.  First-index-of-max matches torch q.max(1)[1] / jnp.argmax ties.
    qmax = jnp.max(q, axis=1, keepdims=True)
    lane = jax.lax.broadcasted_iota(jnp.int32, q.shape, 1)
    a_ref[...] = jnp.min(jnp.where(q == qmax, lane, PAD),
                         axis=1, keepdims=True).astype(jnp.int32)
    # TODO(synk): a lane-dense (1, TM) action row would avoid the masked
    # (TM, 1) store, but needs a sublane->lane relayout; the action stream is
    # only B*4 bytes so it is kept as a column here.


def _tiling(batch):
    """Pick (B_pad, TM).  Small batches -> single grid step (per-step overhead
    ~0.35us dwarfs the compute); large replay batches -> 512-row tiles.  On
    v7x, batches > MAX_SINGLE_TILE give >= 2 'parallel' steps for both TCs."""
    b16 = ((batch + 15) // 16) * 16          # bf16 sublane tile = 16 rows
    if b16 <= MAX_SINGLE_TILE:
        return b16, b16
    n = pl.cdiv(batch, BIG_TM)
    return n * BIG_TM, BIG_TM


def dqn_forward(x, params):
    """x: [B, OBS_DIM] float32 (unpadded).

    Returns the padded layout so downstream consumers pay no extra slice ops:
      q_pad : [B_pad, PAD] float32  (Q-values live in columns [:ACT_DIM])
      a_pad : [B_pad, 1]   int32    (greedy action per row)
    Rows >= B and columns >= ACT_DIM are padding (poisoned Q columns).
    """
    w1, b1, w2, b2, w3, b3 = params
    B = x.shape[0]
    B_pad, TM = _tiling(B)

    # Pad only the batch axis (B_pad x OBS_DIM f32 -- a few hundred bytes),
    # never a (B_pad, 128) slab.
    if B_pad != B:
        x = jnp.zeros((B_pad, OBS_DIM), x.dtype).at[:B].set(x)

    grid = (B_pad // TM,)
    const = lambda i: (0, 0)   # weights/biases: same block every step (resident)

    flops = 2 * B_pad * (OBS_DIM * HIDDEN + HIDDEN * HIDDEN + HIDDEN * PAD)
    bytes_accessed = (
        B_pad * OBS_DIM * 4                                      # x read
        + (OBS_DIM * HIDDEN + HIDDEN * HIDDEN + HIDDEN * PAD) * 2  # bf16 weights
        + (HIDDEN + HIDDEN + PAD) * 4                            # f32 biases
        + B_pad * PAD * 4                                        # q writeback
        + B_pad * 4)                                             # actions

    q_pad, a_pad = pl.pallas_call(
        dqn_kernel,
        out_shape=(
            jax.ShapeDtypeStruct((B_pad, PAD), jnp.float32),
            jax.ShapeDtypeStruct((B_pad, 1), jnp.int32),
        ),
        grid=grid,
        in_specs=[
            pl.BlockSpec((TM, OBS_DIM), lambda i: (i, 0)),    # x (unpadded K)
            pl.BlockSpec((OBS_DIM, HIDDEN), const),           # w1 (4 x 128)
            pl.BlockSpec((1, HIDDEN), const),                 # b1
            pl.BlockSpec((HIDDEN, HIDDEN), const),            # w2
            pl.BlockSpec((1, HIDDEN), const),                 # b2
            pl.BlockSpec((HIDDEN, PAD), const),               # w3 (padded N)
            pl.BlockSpec((1, PAD), const),                    # b3 (poisoned pad)
        ],
        out_specs=(
            pl.BlockSpec((TM, PAD), lambda i: (i, 0)),        # q (lane-dense)
            pl.BlockSpec((TM, 1), lambda i: (i, 0)),          # greedy action
        ),
        compiler_params=pltpu.CompilerParams(
            dimension_semantics=("parallel",),                # v7x: 2 TCs
            vmem_limit_bytes=32 << 20,
        ),
        cost_estimate=pl.CostEstimate(
            flops=flops, transcendentals=0, bytes_accessed=bytes_accessed),
    )(x, w1, b1, w2, b2, w3, b3)

    # TODO(synk): for training-sized batches emit q in bfloat16 to halve the
    # writeback stream (accumulation is already f32); kept f32 here to match
    # the module's float32 forward semantics.
    return q_pad, a_pad


def init_params(key):
    """PyTorch nn.Linear-style init U(-1/sqrt(fan_in), 1/sqrt(fan_in)) on the
    *real* fan-in.  w1 keeps its real (OBS_DIM, HIDDEN) shape; only the action
    dim of layer 3 is padded to 128 lanes, with the padded bias lanes poisoned
    so the in-kernel argmax needs no masking.  Weights bf16, biases f32."""
    keys = jax.random.split(key, 6)

    def linear(kw, kb, fan_in, fan_out):
        bound = 1.0 / math.sqrt(fan_in)
        w = jax.random.uniform(kw, (fan_in, fan_out), jnp.float32, -bound, bound)
        b = jax.random.uniform(kb, (fan_out,), jnp.float32, -bound, bound)
        return w, b

    w1, b1 = linear(keys[0], keys[1], OBS_DIM, HIDDEN)
    w2, b2 = linear(keys[2], keys[3], HIDDEN, HIDDEN)
    w3, b3 = linear(keys[4], keys[5], HIDDEN, ACT_DIM)

    w3p = jnp.zeros((HIDDEN, PAD), jnp.float32).at[:, :ACT_DIM].set(w3)
    b3p = jnp.full((1, PAD), NEG_POISON, jnp.float32).at[0, :ACT_DIM].set(b3)

    return (w1.astype(jnp.bfloat16), b1.reshape(1, HIDDEN),
            w2.astype(jnp.bfloat16), b2.reshape(1, HIDDEN),
            w3p.astype(jnp.bfloat16), b3p)


def dqn_reference(x, params):
    """Plain-JAX reference with the same bf16 weights / f32 accumulation."""
    w1, b1, w2, b2, w3, b3 = params
    h1 = jnp.maximum(jnp.dot(x, w1.astype(jnp.float32)) + b1, 0.0
                     ).astype(jnp.bfloat16)
    h2 = jnp.maximum(
        jnp.dot(h1, w2, preferred_element_type=jnp.float32) + b2, 0.0
    ).astype(jnp.bfloat16)
    q = jnp.dot(h2, w3, preferred_element_type=jnp.float32) + b3
    return q[:, :ACT_DIM]


if __name__ == "__main__":
    BATCH = 32
    key = jax.random.PRNGKey(0)
    kx, kp = jax.random.split(key)
    x = jax.random.normal(kx, (BATCH, OBS_DIM), dtype=jnp.float32)
    params = init_params(kp)

    q_pad, a_pad = dqn_forward(x, params)
    q_pad = jax.block_until_ready(q_pad)
    a_pad = jax.block_until_ready(a_pad)

    # Downstream code may keep the padded layout; slicing only for the checks.
    q = q_pad[:BATCH, :ACT_DIM]
    act = a_pad[:BATCH, 0]

    q_ref = dqn_reference(x, params)
    assert q.shape == (BATCH, ACT_DIM)
    assert act.shape == (BATCH,)
    max_err = jnp.max(jnp.abs(q - q_ref))
    assert jnp.allclose(q, q_ref, atol=1e-2, rtol=1e-2), f"max err {max_err}"
    # fused greedy action must agree with argmax over the kernel's own Q
    assert jnp.all(act == jnp.argmax(q, axis=1))

    # TODO(synk): epsilon-greedy random branch of DQN.act stays host-side
    # (python RNG / control flow); only the greedy path is fused here.

    print("KERNEL_OK")
</pallas_src>

<mosaic_0001>
module attributes {stable_mosaic.version = 11 : i64} {
  func.func @dqn_kernel(%arg0: i32, %arg1: memref<32x4xf32, #tpu.memory_space<vmem>>, %arg2: memref<4x128xbf16, #tpu.memory_space<vmem>>, %arg3: memref<1x128xf32, #tpu.memory_space<vmem>>, %arg4: memref<128x128xbf16, #tpu.memory_space<vmem>>, %arg5: memref<1x128xf32, #tpu.memory_space<vmem>>, %arg6: memref<128x128xbf16, #tpu.memory_space<vmem>>, %arg7: memref<1x128xf32, #tpu.memory_space<vmem>>, %arg8: memref<32x128xf32, #tpu.memory_space<vmem>>, %arg9: memref<32x1xi32, #tpu.memory_space<vmem>>) attributes {dimension_semantics = [#tpu.dimension_semantics<parallel>], iteration_bounds = array<i64: 1>, scalar_prefetch = 0 : i64, scratch_operands = 0 : i64, tpu.core_type = #tpu.core_type<tc>, window_params = [{transform_indices = @transform_0, window_bounds = array<i64: 32, 4>}, {pipeline_mode = #tpu.pipeline_mode<synchronous>, transform_indices = @transform_1, window_bounds = array<i64: 4, 128>}, {pipeline_mode = #tpu.pipeline_mode<synchronous>, transform_indices = @transform_2, window_bounds = array<i64: 1, 128>}, {pipeline_mode = #tpu.pipeline_mode<synchronous>, transform_indices = @transform_3, window_bounds = array<i64: 128, 128>}, {pipeline_mode = #tpu.pipeline_mode<synchronous>, transform_indices = @transform_4, window_bounds = array<i64: 1, 128>}, {pipeline_mode = #tpu.pipeline_mode<synchronous>, transform_indices = @transform_5, window_bounds = array<i64: 128, 128>}, {pipeline_mode = #tpu.pipeline_mode<synchronous>, transform_indices = @transform_6, window_bounds = array<i64: 1, 128>}, {transform_indices = @transform_7, window_bounds = array<i64: 32, 128>}, {transform_indices = @transform_8, window_bounds = array<i64: 32, 1>}]} {
    %c0 = arith.constant 0 : index
    %c0_0 = arith.constant 0 : index
    %0 = vector.load %arg1[%c0, %c0_0] : memref<32x4xf32, #tpu.memory_space<vmem>>, vector<32x4xf32>
    %c0_1 = arith.constant 0 : index
    %c0_2 = arith.constant 0 : index
    %1 = vector.load %arg2[%c0_1, %c0_2] : memref<4x128xbf16, #tpu.memory_space<vmem>>, vector<4x128xbf16>
    %2 = arith.extf %1 : vector<4x128xbf16> to vector<4x128xf32>
    %c0_3 = arith.constant 0 : index
    %c0_4 = arith.constant 0 : index
    %3 = vector.load %arg3[%c0_3, %c0_4] : memref<1x128xf32, #tpu.memory_space<vmem>>, vector<1x128xf32>
    %4 = vector.extract_strided_slice %0 {offsets = [0, 0], sizes = [32, 1], strides = [1, 1]} : vector<32x4xf32> to vector<32x1xf32>
    %5 = vector.extract_strided_slice %2 {offsets = [0, 0], sizes = [1, 128], strides = [1, 1]} : vector<4x128xf32> to vector<1x128xf32>
    %6 = vector.broadcast %4 : vector<32x1xf32> to vector<32x128xf32>
    %7 = vector.broadcast %5 : vector<1x128xf32> to vector<32x128xf32>
    %8 = arith.mulf %6, %7 : vector<32x128xf32>
    %9 = vector.broadcast %3 : vector<1x128xf32> to vector<32x128xf32>
    %10 = arith.addf %9, %8 : vector<32x128xf32>
    %11 = vector.extract_strided_slice %0 {offsets = [0, 1], sizes = [32, 1], strides = [1, 1]} : vector<32x4xf32> to vector<32x1xf32>
    %12 = vector.extract_strided_slice %2 {offsets = [1, 0], sizes = [1, 128], strides = [1, 1]} : vector<4x128xf32> to vector<1x128xf32>
    %13 = vector.broadcast %11 : vector<32x1xf32> to vector<32x128xf32>
    %14 = vector.broadcast %12 : vector<1x128xf32> to vector<32x128xf32>
    %15 = arith.mulf %13, %14 : vector<32x128xf32>
    %16 = arith.addf %10, %15 : vector<32x128xf32>
    %17 = vector.extract_strided_slice %0 {offsets = [0, 2], sizes = [32, 1], strides = [1, 1]} : vector<32x4xf32> to vector<32x1xf32>
    %18 = vector.extract_strided_slice %2 {offsets = [2, 0], sizes = [1, 128], strides = [1, 1]} : vector<4x128xf32> to vector<1x128xf32>
    %19 = vector.broadcast %17 : vector<32x1xf32> to vector<32x128xf32>
    %20 = vector.broadcast %18 : vector<1x128xf32> to vector<32x128xf32>
    %21 = arith.mulf %19, %20 : vector<32x128xf32>
    %22 = arith.addf %16, %21 : vector<32x128xf32>
    %23 = vector.extract_strided_slice %0 {offsets = [0, 3], sizes = [32, 1], strides = [1, 1]} : vector<32x4xf32> to vector<32x1xf32>
    %24 = vector.extract_strided_slice %2 {offsets = [3, 0], sizes = [1, 128], strides = [1, 1]} : vector<4x128xf32> to vector<1x128xf32>
    %25 = vector.broadcast %23 : vector<32x1xf32> to vector<32x128xf32>
    %26 = vector.broadcast %24 : vector<1x128xf32> to vector<32x128xf32>
    %27 = arith.mulf %25, %26 : vector<32x128xf32>
    %28 = arith.addf %22, %27 : vector<32x128xf32>
    %cst = arith.constant 0.000000e+00 : f32
    %29 = vector.broadcast %cst : f32 to vector<32x128xf32>
    %30 = arith.maximumf %28, %29 : vector<32x128xf32>
    %31 = arith.truncf %30 : vector<32x128xf32> to vector<32x128xbf16>
    %c0_5 = arith.constant 0 : index
    %c0_6 = arith.constant 0 : index
    %32 = vector.load %arg4[%c0_5, %c0_6] : memref<128x128xbf16, #tpu.memory_space<vmem>>, vector<128x128xbf16>
    %cst_7 = arith.constant dense<0.000000e+00> : vector<32x128xf32>
    %33 = tpu.matmul %31, %32, %cst_7 {dimension_numbers = #tpu.dot_dimension_numbers<[1], [0], [0], [1], [0, 0, 1, 1], [], []>} : vector<32x128xbf16>, vector<128x128xbf16>, vector<32x128xf32> -> vector<32x128xf32>
    %c0_8 = arith.constant 0 : index
    %c0_9 = arith.constant 0 : index
    %34 = vector.load %arg5[%c0_8, %c0_9] : memref<1x128xf32, #tpu.memory_space<vmem>>, vector<1x128xf32>
    %35 = vector.broadcast %34 : vector<1x128xf32> to vector<32x128xf32>
    %36 = arith.addf %33, %35 : vector<32x128xf32>
    %cst_10 = arith.constant 0.000000e+00 : f32
    %37 = vector.broadcast %cst_10 : f32 to vector<32x128xf32>
    %38 = arith.maximumf %36, %37 : vector<32x128xf32>
    %39 = arith.truncf %38 : vector<32x128xf32> to vector<32x128xbf16>
    %c0_11 = arith.constant 0 : index
    %c0_12 = arith.constant 0 : index
    %40 = vector.load %arg6[%c0_11, %c0_12] : memref<128x128xbf16, #tpu.memory_space<vmem>>, vector<128x128xbf16>
    %cst_13 = arith.constant dense<0.000000e+00> : vector<32x128xf32>
    %41 = tpu.matmul %39, %40, %cst_13 {dimension_numbers = #tpu.dot_dimension_numbers<[1], [0], [0], [1], [0, 0, 1, 1], [], []>} : vector<32x128xbf16>, vector<128x128xbf16>, vector<32x128xf32> -> vector<32x128xf32>
    %c0_14 = arith.constant 0 : index
    %c0_15 = arith.constant 0 : index
    %42 = vector.load %arg7[%c0_14, %c0_15] : memref<1x128xf32, #tpu.memory_space<vmem>>, vector<1x128xf32>
    %43 = vector.broadcast %42 : vector<1x128xf32> to vector<32x128xf32>
    %44 = arith.addf %41, %43 : vector<32x128xf32>
    %c0_16 = arith.constant 0 : index
    %c0_17 = arith.constant 0 : index
    %45 = vector.load %arg8[%c0_16, %c0_17] : memref<32x128xf32, #tpu.memory_space<vmem>>, vector<32x128xf32>
    tpu.vector_store %arg8[%c0_16, %c0_17], %44 {strides = array<i32>} : memref<32x128xf32, #tpu.memory_space<vmem>>, vector<32x128xf32>,
    %cst_18 = arith.constant dense<0xFF800000> : vector<32xf32>
    %46 = vector.multi_reduction <maximumf>, %44, %cst_18 [1] : vector<32x128xf32> to vector<32xf32>
    %47 = vector.shape_cast %46 : vector<32xf32> to vector<32x1xf32>
    %48 = tpu.iota {dimensions = array<i32: 1>} : vector<32x128xi32>
    %49 = vector.broadcast %47 : vector<32x1xf32> to vector<32x128xf32>
    %50 = arith.cmpf oeq, %44, %49 : vector<32x128xf32>
    %c128_i32 = arith.constant 128 : i32
    %51 = vector.broadcast %c128_i32 : i32 to vector<32x128xi32>
    %52 = arith.select %50, %48, %51 : vector<32x128xi1>, vector<32x128xi32>
    %cst_19 = arith.constant dense<2147483647> : vector<32xi32>
    %53 = vector.multi_reduction <minsi>, %52, %cst_19 [1] : vector<32x128xi32> to vector<32xi32>
    %54 = vector.shape_cast %53 : vector<32xi32> to vector<32x1xi32>
    %c0_20 = arith.constant 0 : index
    %c0_21 = arith.constant 0 : index
    %55 = vector.load %arg9[%c0_20, %c0_21] : memref<32x1xi32, #tpu.memory_space<vmem>>, vector<32x1xi32>
    tpu.vector_store %arg9[%c0_20, %c0_21], %54 {strides = array<i32>} : memref<32x1xi32, #tpu.memory_space<vmem>>, vector<32x1xi32>,
    return
  }
  func.func @transform_0(%arg0: i32) -> (i32, i32) {
    %c0_i32 = arith.constant 0 : i32
    %c0_i32_0 = arith.constant 0 : i32
    return %arg0, %c0_i32 : i32, i32
  }
  func.func @transform_1(%arg0: i32) -> (i32, i32) {
    %c0_i32 = arith.constant 0 : i32
    %c0_i32_0 = arith.constant 0 : i32
    %c0_i32_1 = arith.constant 0 : i32
    return %c0_i32, %c0_i32_0 : i32, i32
  }
  func.func @transform_2(%arg0: i32) -> (i32, i32) {
    %c0_i32 = arith.constant 0 : i32
    %c0_i32_0 = arith.constant 0 : i32
    %c0_i32_1 = arith.constant 0 : i32
    return %c0_i32, %c0_i32_0 : i32, i32
  }
  func.func @transform_3(%arg0: i32) -> (i32, i32) {
    %c0_i32 = arith.constant 0 : i32
    %c0_i32_0 = arith.constant 0 : i32
    %c0_i32_1 = arith.constant 0 : i32
    return %c0_i32, %c0_i32_0 : i32, i32
  }
  func.func @transform_4(%arg0: i32) -> (i32, i32) {
    %c0_i32 = arith.constant 0 : i32
    %c0_i32_0 = arith.constant 0 : i32
    %c0_i32_1 = arith.constant 0 : i32
    return %c0_i32, %c0_i32_0 : i32, i32
  }
  func.func @transform_5(%arg0: i32) -> (i32, i32) {
    %c0_i32 = arith.constant 0 : i32
    %c0_i32_0 = arith.constant 0 : i32
    %c0_i32_1 = arith.constant 0 : i32
    return %c0_i32, %c0_i32_0 : i32, i32
  }
  func.func @transform_6(%arg0: i32) -> (i32, i32) {
    %c0_i32 = arith.constant 0 : i32
    %c0_i32_0 = arith.constant 0 : i32
    %c0_i32_1 = arith.constant 0 : i32
    return %c0_i32, %c0_i32_0 : i32, i32
  }
  func.func @transform_7(%arg0: i32) -> (i32, i32) {
    %c0_i32 = arith.constant 0 : i32
    %c0_i32_0 = arith.constant 0 : i32
    return %arg0, %c0_i32 : i32, i32
  }
  func.func @transform_8(%arg0: i32) -> (i32, i32) {
    %c0_i32 = arith.constant 0 : i32
    %c0_i32_0 = arith.constant 0 : i32
    return %arg0, %c0_i32 : i32, i32
  }
}

</mosaic_0001>

<bundles_post_ra>
// kernel: tpu_custom_call.1
= control target key start
LH: loop header
LB: loop body
LE: loop exit
PB: predicated region body
PF: predicated region fallthrough
CT: control target
= control target key end

     0   :  { %14 = vsyncpa [#allocation3], 0  ;;  %s775_s0 = inlined_call_operand.vmem [shape: f32[32,4], index: 0, kind: input, shape index: {}]   ;;  %s776_s1 = inlined_call_operand.vmem [shape: bf16[4,128], index: 1, kind: input, shape index: {}]   ;;  %s777_s2 = inlined_call_operand.vmem [shape: f32[1,128], index: 2, kind: input, shape index: {}]   ;;  %s778_s3 = inlined_call_operand.hbm [shape: bf16[128,128], index: 3, kind: input, shape index: {}]   ;;  %s779_s4 = inlined_call_operand.vmem [shape: f32[1,128], index: 4, kind: input, shape index: {}]   ;;  %s780_s5 = inlined_call_operand.hbm [shape: bf16[128,128], index: 5, kind: input, shape index: {}]   ;;  %s781_s6 = inlined_call_operand.vmem [shape: f32[1,128], index: 6, kind: input, shape index: {}]   ;;  %s782_s7 = inlined_call_operand.hbm [shape: f32[32,128], index: 7, kind: output, shape index: {0}]   ;;  %s783_s8 = inlined_call_operand.vmem [shape: s32[32,1], index: 8, kind: output, shape index: {1}]  }
   0x1   :  { %15 = vsyncpa [#allocation6], 0 }
   0x2   :  { %16 = vsyncpa [#allocation4], 0  ;;  %s27_s29 = sshll.u32 %s778_s3, 4  ;;  %s670_s30 = smov [#allocation2]   ;;  %s28_s29 = int_to_ptr.hbm [resolvable:$true] %s27_s29 }
   0x3   :  { %s29_s9 = sshll.u32 %s670_s30, 4  ;;  %s42_s12 = sshll.u32 %s780_s5, 4  ;;  %s30_s9 = int_to_ptr.vmem [resolvable:$true] %s29_s9  ;;  %s43_s12 = int_to_ptr.hbm [resolvable:$true] %s42_s12 }
   0x4   :  { %s671_s13 = smov 64   ;;  %s672_s14 = smov 4  }
   0x5   :  { %35 = dma.hbm_to_vmem [thread:$0]  %s28_s29, 1024, %s30_s9, [#allocation3], %s671_s13, %s671_s13, %s672_s14  }
   0x6   :  { %s673_s15 = smov [#allocation5]  }
   0x7   :  { %s44_s16 = sshll.u32 %s673_s15, 4  ;;  %s45_s16 = int_to_ptr.vmem [resolvable:$true] %s44_s16 }
   0x8   :  { %50 = dma.hbm_to_vmem [thread:$0]  %s43_s12, 1024, %s45_s16, [#allocation6], %s671_s13, %s671_s13, %s672_s14  }
   0x9   :  { %664 = dma.done.wait [#allocation3], 1024  }
   0xa   :  { %665 = vsyncadd [#allocation3], 4294966272 }
   0xb   :  { %666 = dma.done.wait [#allocation6], 1024  }
   0xc   :  { %667 = vsyncadd [#allocation6], 4294966272  ;;  %v674_v0 = vmov 1   ;;  %v675_v1 = vmov 0   ;;  %v676_v2 = vmov 2   ;;  %v63_v3 = vld [vmem:[%s775_s0 + $0x10] sm:$0xff] }
   0xd   :  { %576 = vset.pattern.permute.xlu1 %v674_v0  ;;  %575 = vset.pattern.permute.xlu0 %v675_v1  ;;  %v64_v4 = vld [vmem:[%s775_s0 + $0x18] sm:$0xff]  ;;  %v677_v5 = vmov 3   ;;  %v61_v6 = vld [vmem:[%s775_s0] sm:$0xff]  ;;  %v62_v7 = vld [vmem:[%s775_s0 + $0x8] sm:$0xff]  ;;  %s450_s30 = sshll.u32 %s782_s7, 4  ;;  %s679_s9 = smov 128   ;;  %s451_s30 = int_to_ptr.hbm [resolvable:$true] %s450_s30 }
   0xe   :  { %577 = vset.pattern.permute.xlu2 %v676_v2  ;;  %109 = vperm.xlu1 %576, %v63_v3   ;;  %v539_v8 = vld [vmem:[#allocation2 + $0x38] sm:$0xff]  ;;  %v538_v9 = vld [vmem:[#allocation2 + $0x30] sm:$0xff]  ;;  %v537_v10 = vld [vmem:[#allocation2 + $0x28] sm:$0xff]  ;;  %s680_s10 = smov 8   ;;  %vm439_vm8 = vcmask 7168  }
   0xf   :  { %80 = vperm.xlu0 %575, %v63_v3   ;;  %134 = vperm.xlu2 %577, %v63_v3   ;;  %v536_v11 = vld [vmem:[#allocation2 + $0x20] sm:$0xff]  ;;  %v535_v12 = vld [vmem:[#allocation2 + $0x18] sm:$0xff]  ;;  %v534_v13 = vld [vmem:[#allocation2 + $0x10] sm:$0xff] }
  0x10   :  { %548 = vmatpush.bf16.msra.mxu2 %v539_v8  ;;  %249 = vmatpush.bf16.msra.mxu0 %v539_v8  ;;  %v533_v14 = vld [vmem:[#allocation2 + $0x8] sm:$0xff]  ;;  %v532_v16 = vld [vmem:[#allocation2] sm:$0xff]  ;;  %v547_v49 = vld [vmem:[#allocation5 + $0x38] sm:$0xff] }
  0x11   :  { %v65_v17 = vld [vmem:[%s776_s1] sm:$0x3]  ;;  %556 = vmatpush.bf16.msra.mxu3 %v547_v49  ;;  %v546_v52 = vld [vmem:[#allocation5 + $0x30] sm:$0xff]  ;;  %342 = vmatpush.bf16.msra.mxu1 %v547_v49  ;;  %v545_v55 = vld [vmem:[#allocation5 + $0x28] sm:$0xff] }
  0x12   :  { %v66_v19 = vunpack.c.l.bf16 %v65_v17  ;;  %v589_v23 = vld [vmem:[%s777_s2] ss:$0 sm:$0xff]  ;;  %v543_v17 = vld [vmem:[#allocation5 + $0x18] sm:$0xff] }
  0x13   :  { %v544_v59 = vld [vmem:[#allocation5 + $0x20] sm:$0xff] }
  0x14   :  { %549 = vmatpush.bf16.msra.mxu2 %v538_v9  ;;  %250 = vmatpush.bf16.msra.mxu0 %v538_v9  ;;  %v88_v22 = vperm.slane %v66_v19, 0  ;;  %v116_v26 = vperm.slane %v66_v19, 1  ;;  %v141_v32 = vperm.slane %v66_v19, 2  ;;  %v166_v37 = vperm.slane %v66_v19, 3  ;;  %v541_v19 = vld [vmem:[#allocation5 + $0x8] sm:$0xff] }
  0x15   :  { %557 = vmatpush.bf16.msra.mxu3 %v546_v52  ;;  %343 = vmatpush.bf16.msra.mxu1 %v546_v52 }
  0x16   :  { %113 = vperm.xlu1 %576, %v64_v4  }
  0x17   :  { %85 = vperm.xlu0 %575, %v64_v4   ;;  %138 = vperm.xlu2 %577, %v64_v4  }
  0x18   :  { %550 = vmatpush.bf16.msra.mxu2 %v537_v10  ;;  %251 = vmatpush.bf16.msra.mxu0 %v537_v10 }
  0x19   :  { %558 = vmatpush.bf16.msra.mxu3 %v545_v55  ;;  %344 = vmatpush.bf16.msra.mxu1 %v545_v55 }
  0x1c   :  { %551 = vmatpush.bf16.msra.mxu2 %v536_v11  ;;  %252 = vmatpush.bf16.msra.mxu0 %v536_v11 }
  0x1d   :  { %559 = vmatpush.bf16.msra.mxu3 %v544_v59  ;;  %345 = vmatpush.bf16.msra.mxu1 %v544_v59 }
  0x1e   :  { %579 = vset.pattern.permute.xlu1 %v677_v5 }
  0x1f   :  { %578 = vset.pattern.permute.xlu0 %v677_v5  ;;  %163 = vperm.xlu1 %579, %v64_v4  }
  0x20   :  { %159 = vperm.xlu0 %578, %v63_v3   ;;  %580 = vset.pattern.permute.xlu2 %v675_v1 }
  0x21   :  { %70 = vperm.xlu2 %580, %v61_v6   ;;  %552 = vmatpush.bf16.msra.mxu2 %v535_v12 }
  0x22   :  { %253 = vmatpush.bf16.msra.mxu0 %v535_v12  ;;  %560 = vmatpush.bf16.msra.mxu3 %v543_v17 }
  0x23   :  { %346 = vmatpush.bf16.msra.mxu1 %v543_v17 }
  0x25   :  { %553 = vmatpush.bf16.msra.mxu2 %v534_v13 }
  0x26   :  { %254 = vmatpush.bf16.msra.mxu0 %v534_v13 }
  0x27   :  { %581 = vset.pattern.permute.xlu1 %v675_v1 }
  0x28   :  { %583 = vset.pattern.permute.xlu0 %v674_v0  ;;  %75 = vperm.xlu1 %581, %v62_v7  }
  0x29   :  { %105 = vperm.xlu0 %583, %v62_v7   ;;  %582 = vset.pattern.permute.xlu2 %v674_v0 }
  0x2a   :  { %101 = vperm.xlu2 %582, %v61_v6   ;;  %554 = vmatpush.bf16.msra.mxu2 %v533_v14 }
  0x2b   :  { %255 = vmatpush.bf16.msra.mxu0 %v533_v14 }
  0x2e   :  { %555 = vmatpush.bf16.msra.mxu2 %v532_v16 }
  0x2f   :  { %256 = vmatpush.bf16.msra.mxu0 %v532_v16 }
  0x30   :  { %584 = vset.pattern.permute.xlu1 %v676_v2 }
  0x31   :  { %588 = vset.pattern.permute.xlu0 %v677_v5  ;;  %126 = vperm.xlu1 %584, %v61_v6  }
  0x32   :  { %585 = vset.pattern.permute.xlu2 %v676_v2 }
  0x33   :  { %130 = vperm.xlu2 %585, %v62_v7  }
  0x39   :  { %586 = vset.pattern.permute.xlu1 %v677_v5 }
  0x3a   :  { %151 = vperm.xlu1 %586, %v61_v6  }
  0x3b   :  { %587 = vset.pattern.permute.xlu2 %v677_v5 }
  0x3c   :  { %155 = vperm.xlu2 %587, %v62_v7  }
  0x69   :  { %v135_v15 = vpop.permute.xlu2 %134 }
  0x6a   :  { %v144_v38 = vmul.f32 %v141_v32, %v135_v15 }
  0x71   :  { %v139_v18 = vpop.permute.xlu2 %138 }
  0x72   :  { %v145_v39 = vmul.f32 %v141_v32, %v139_v18  ;;  %v542_v18 = vld [vmem:[#allocation5 + $0x10] sm:$0xff] }
  0x73   :  { %561 = vmatpush.bf16.msra.mxu3 %v542_v18  ;;  %347 = vmatpush.bf16.msra.mxu1 %v542_v18 }
  0x77   :  { %562 = vmatpush.bf16.msra.mxu3 %v541_v19  ;;  %348 = vmatpush.bf16.msra.mxu1 %v541_v19 }
  0x7b   :  { %v71_v25 = vpop.permute.xlu2 %70 }
  0x7c   :  { %v89_v62 = vmul.f32 %v88_v22, %v71_v25 }
  0x7e   :  { %v96_v3 = vadd.f32 %v589_v23, %v89_v62 }
  0x80   :  { %v110_v20 = vpop.permute.xlu1 %109 }
  0x81   :  { %v81_v21 = vpop.permute.xlu0 %80  ;;  %v119_v33 = vmul.f32 %v116_v26, %v110_v20  ;;  %v540_v20 = vld [vmem:[#allocation5] sm:$0xff] }
  0x82   :  { %v91_v24 = vmul.f32 %v88_v22, %v81_v21  ;;  %563 = vmatpush.bf16.msra.mxu3 %v540_v20  ;;  %349 = vmatpush.bf16.msra.mxu1 %v540_v20 }
  0x84   :  { %v98_v30 = vadd.f32 %v589_v23, %v91_v24  ;;  %v102_v42 = vpop.permute.xlu2 %101 }
  0x85   :  { %v117_v4 = vmul.f32 %v116_v26, %v102_v42 }
  0x86   :  { %v123_v35 = vadd.f32 %v119_v33, %v98_v30 }
  0x87   :  { %v121_v8 = vadd.f32 %v117_v4, %v96_v3 }
  0x88   :  { %v114_v27 = vpop.permute.xlu1 %113  ;;  %v148_v45 = vadd.f32 %v144_v38, %v123_v35 }
  0x89   :  { %v86_v28 = vpop.permute.xlu0 %85  ;;  %v120_v34 = vmul.f32 %v116_v26, %v114_v27 }
  0x8a   :  { %v92_v29 = vmul.f32 %v88_v22, %v86_v28 }
  0x8c   :  { %v99_v31 = vadd.f32 %v589_v23, %v92_v29 }
  0x8d   :  { %v131_v56 = vpop.permute.xlu2 %130 }
  0x8e   :  { %v124_v36 = vadd.f32 %v120_v34, %v99_v31  ;;  %v143_v0 = vmul.f32 %v141_v32, %v131_v56 }
  0x90   :  { %v149_v43 = vadd.f32 %v145_v39, %v124_v36  ;;  %v591_v36 = vld [vmem:[%s781_s6] ss:$0 sm:$0xff] }
  0x91   :  { %v164_v40 = vpop.permute.xlu1 %163 }
  0x92   :  { %v160_v41 = vpop.permute.xlu0 %159  ;;  %v170_v44 = vmul.f32 %v166_v37, %v164_v40 }
  0x93   :  { %v169_v46 = vmul.f32 %v166_v37, %v160_v41 }
  0x94   :  { %v174_v47 = vadd.f32 %v170_v44, %v149_v43 }
  0x95   :  { %v173_v48 = vadd.f32 %v169_v46, %v148_v45  ;;  %v373_v45 = vlaneseq }
  0x96   :  { %v178_v50 = vmax.f32 %v174_v47, 0.0  ;;  %v156_v2 = vpop.permute.xlu2 %155 }
  0x97   :  { %v177_v51 = vmax.f32 %v173_v48, 0.0  ;;  %v168_v6 = vmul.f32 %v166_v37, %v156_v2  ;;  %v374_v46 = vand.u32 127, %v373_v45 }
  0x99   :  { %v180_v53 = vpack.c.bf16 %v178_v50, %v177_v51 }
  0x9a   :  { %v76_v54 = vpop.permute.xlu1 %75 }
  0x9b   :  { %262 = vmatmul.bf16.vlgmr.msra.gmra.mxu2 %v180_v53  ;;  %v90_v57 = vmul.f32 %v88_v22, %v76_v54  ;;  %v106_v58 = vpop.permute.xlu0 %105  ;;  %v590_v22 = vld [vmem:[%s779_s4] ss:$0 sm:$0xff]  ;;  %s678_s4 = smov [#allocation7]  }
  0x9c   :  { %v118_v61 = vmul.f32 %v116_v26, %v106_v58  ;;  %s448_s6 = sshll.u32 %s678_s4, 4  ;;  %s449_s6 = int_to_ptr.vmem [resolvable:$true] %s448_s6 }
  0x9d   :  { %v97_v60 = vadd.f32 %v589_v23, %v90_v57 }
  0x9f   :  { %v122_v1 = vadd.f32 %v118_v61, %v97_v60 }
  0xa1   :  { %v147_v5 = vadd.f32 %v143_v0, %v122_v1 }
  0xa3   :  { %v127_v63 = vpop.permute.xlu1 %126  ;;  %v172_v10 = vadd.f32 %v168_v6, %v147_v5 }
  0xa4   :  { %v142_v7 = vmul.f32 %v141_v32, %v127_v63 }
  0xa5   :  { %v176_v14 = vmax.f32 %v172_v10, 0.0 }
  0xa6   :  { %v146_v11 = vadd.f32 %v142_v7, %v121_v8 }
  0xac   :  { %v152_v9 = vpop.permute.xlu1 %151 }
  0xad   :  { %v167_v12 = vmul.f32 %v166_v37, %v152_v9 }
  0xaf   :  { %v171_v13 = vadd.f32 %v167_v12, %v146_v11 }
  0xb1   :  { %v175_v15 = vmax.f32 %v171_v13, 0.0 }
  0xb3   :  { %v179_v16 = vpack.c.bf16 %v176_v14, %v175_v15 }
  0xb5   :  { %257 = vmatmul.bf16.vlgmr.msra.gmra.mxu0 %v179_v16 }
 0x11e   :  { %v263_v21 = vpop.f32.mrf.mxu2 }
 0x11f   :  { %v264_v23 = vadd.f32 %v590_v22, %v263_v21 }
 0x121   :  { %v270_v26 = vmax.f32 %v264_v23, 0.0 }
 0x126   :  { %v265_v24 = vpop.f32.mrf.mxu2 }
 0x127   :  { %v266_v25 = vadd.f32 %v590_v22, %v265_v24 }
 0x129   :  { %v271_v27 = vmax.f32 %v266_v25, 0.0 }
 0x12b   :  { %v273_v28 = vpack.c.bf16 %v271_v27, %v270_v26 }
 0x12d   :  { %355 = vmatmul.bf16.vlgmr.msra.gmra.mxu3 %v273_v28 }
 0x132   :  { %v258_v29 = vpop.f32.mrf.mxu0 }
 0x133   :  { %v259_v30 = vadd.f32 %v590_v22, %v258_v29 }
 0x135   :  { %v268_v33 = vmax.f32 %v259_v30, 0.0 }
 0x13a   :  { %v260_v31 = vpop.f32.mrf.mxu0 }
 0x13b   :  { %v261_v32 = vadd.f32 %v590_v22, %v260_v31 }
 0x13d   :  { %v269_v34 = vmax.f32 %v261_v32, 0.0 }
 0x13f   :  { %v272_v35 = vpack.c.bf16 %v269_v34, %v268_v33 }
 0x141   :  { %350 = vmatmul.bf16.vlgmr.msra.gmra.mxu1 %v272_v35 }
 0x1b0   :  { %v356_v37 = vpop.f32.mrf.mxu3 }
 0x1b1   :  { %v357_v38 = vadd.f32 %v591_v36, %v356_v37 }
 0x1b3   :  { %363 = vst [vmem:[#allocation7 + $0x10] sm:$0xff] %v357_v38  ;;  %369 = vmax.xlane.f32.xlu2 %v357_v38 }
 0x1b8   :  { %v358_v39 = vpop.f32.mrf.mxu3 }
 0x1b9   :  { %v359_v40 = vadd.f32 %v591_v36, %v358_v39 }
 0x1bb   :  { %364 = vst [vmem:[#allocation7 + $0x18] sm:$0xff] %v359_v40  ;;  %371 = vmax.xlane.f32.xlu2 %v359_v40 }
 0x1be   :  { %v351_v41 = vpop.f32.mrf.mxu1 }
 0x1bf   :  { %v352_v42 = vadd.f32 %v591_v36, %v351_v41 }
 0x1c1   :  { %361 = vst [vmem:[#allocation7] sm:$0xff] %v352_v42  ;;  %365 = vmax.xlane.f32.xlu0 %v352_v42 }
 0x1c6   :  { %v353_v43 = vpop.f32.mrf.mxu1 }
 0x1c7   :  { %v354_v44 = vadd.f32 %v591_v36, %v353_v43 }
 0x1c9   :  { %362 = vst [vmem:[#allocation7 + $0x8] sm:$0xff] %v354_v44  ;;  %367 = vmax.xlane.f32.xlu1 %v354_v44 }
 0x1ca   :  { %456 = dma.vmem_to_hbm [thread:$0]  %s449_s6, 512, %s451_s30, [#allocation4], %s679_s9, %s679_s9, %s680_s10  }
 0x226   :  { %v370_v47 = vpop.xlane.xlu2 %369 }
 0x227   :  { %vm377_vm0 = vcmp.eq.f32.partialorder %v357_v38, %v370_v47 }
 0x228   :  { %v381_v48 = vsel %vm377_vm0, %v374_v46, 128 }
 0x229   :  { %v412_v49 = vshra.s32 %v381_v48, 16  ;;  %v411_v63 = vand.u32 65535, %v381_v48 }
 0x22b   :  { %v414_v50 = vcvt.s32.f32 %v412_v49  ;;  %v413_v1 = vcvt.s32.f32 %v411_v63 }
 0x22d   :  { %415 = vmin.xlane.f32.xlu2 %v414_v50 }
 0x22e   :  { %v372_v51 = vpop.xlane.xlu2 %371 }
 0x22f   :  { %vm378_vm2 = vcmp.eq.f32.partialorder %v359_v40, %v372_v51 }
 0x230   :  { %v382_v56 = vsel %vm378_vm2, %v374_v46, 128 }
 0x231   :  { %v426_v58 = vshra.s32 %v382_v56, 16  ;;  %v425_v7 = vand.u32 65535, %v382_v56 }
 0x233   :  { %v428_v62 = vcvt.s32.f32 %v426_v58  ;;  %v427_v12 = vcvt.s32.f32 %v425_v7 }
 0x234   :  { %v366_v52 = vpop.xlane.xlu0 %365 }
 0x235   :  { %vm375_vm1 = vcmp.eq.f32.partialorder %v352_v42, %v366_v52 }
 0x236   :  { %v379_v53 = vsel %vm375_vm1, %v374_v46, 128 }
 0x237   :  { %v384_v54 = vshra.s32 %v379_v53, 16  ;;  %v383_v3 = vand.u32 65535, %v379_v53 }
 0x239   :  { %v386_v55 = vcvt.s32.f32 %v384_v54  ;;  %v385_v5 = vcvt.s32.f32 %v383_v3 }
 0x23b   :  { %387 = vmin.xlane.f32.xlu0 %v386_v55 }
 0x23c   :  { %v368_v57 = vpop.xlane.xlu1 %367 }
 0x23d   :  { %vm376_vm3 = vcmp.eq.f32.partialorder %v354_v44, %v368_v57 }
 0x23e   :  { %v380_v59 = vsel %vm376_vm3, %v374_v46, 128 }
 0x23f   :  { %v398_v60 = vshra.s32 %v380_v59, 16  ;;  %v397_v8 = vand.u32 65535, %v380_v59 }
 0x241   :  { %v400_v61 = vcvt.s32.f32 %v398_v60  ;;  %v399_v11 = vcvt.s32.f32 %v397_v8 }
 0x243   :  { %401 = vmin.xlane.f32.xlu1 %v400_v61  ;;  %429 = vmin.xlane.f32.xlu0 %v428_v62 }
 0x2a0   :  { %v416_v0 = vpop.xlane.xlu2 %415 }
 0x2a1   :  { %vm417_vm4 = vcmp.eq.f32.partialorder %v414_v50, %v416_v0  ;;  %v422_v15 = vcvt.f32.s32 %v416_v0 }
 0x2a2   :  { %v418_v2 = vsel %vm417_vm4, %v413_v1, inf }
 0x2a3   :  { %419 = vmin.xlane.f32.xlu0 %v418_v2  ;;  %v423_v17 = vshll.u32 %v422_v15, 16 }
 0x2ae   :  { %v388_v4 = vpop.xlane.xlu0 %387 }
 0x2af   :  { %vm389_vm5 = vcmp.eq.f32.partialorder %v386_v55, %v388_v4  ;;  %v394_v20 = vcvt.f32.s32 %v388_v4 }
 0x2b0   :  { %v390_v6 = vsel %vm389_vm5, %v385_v5, inf }
 0x2b1   :  { %391 = vmin.xlane.f32.xlu1 %v390_v6  ;;  %v395_v22 = vshll.u32 %v394_v20, 16 }
 0x2b6   :  { %v402_v9 = vpop.xlane.xlu1 %401  ;;  %v430_v10 = vpop.xlane.xlu0 %429 }
 0x2b7   :  { %vm403_vm6 = vcmp.eq.f32.partialorder %v400_v61, %v402_v9  ;;  %vm431_vm7 = vcmp.eq.f32.partialorder %v428_v62, %v430_v10  ;;  %v408_v25 = vcvt.f32.s32 %v402_v9  ;;  %v436_v26 = vcvt.f32.s32 %v430_v10 }
 0x2b8   :  { %v404_v13 = vsel %vm403_vm6, %v399_v11, inf  ;;  %v432_v14 = vsel %vm431_vm7, %v427_v12, inf }
 0x2b9   :  { %405 = vmin.xlane.f32.xlu2 %v404_v13  ;;  %433 = vmin.xlane.f32.xlu1 %v432_v14  ;;  %v409_v29 = vshll.u32 %v408_v25, 16  ;;  %v437_v30 = vshll.u32 %v436_v26, 16 }
 0x316   :  { %v420_v16 = vpop.xlane.xlu0 %419 }
 0x317   :  { %v421_v18 = vcvt.f32.s32 %v420_v16 }
 0x319   :  { %v424_v19 = vadd.s32 %v423_v17, %v421_v18 }
 0x31b   :  { %442 = vst.msk [vmem:[%s783_s8 + $0x10] sm:$0xff] %vm439_vm8, %v424_v19 }
 0x324   :  { %v392_v21 = vpop.xlane.xlu1 %391 }
 0x325   :  { %v393_v23 = vcvt.f32.s32 %v392_v21 }
 0x327   :  { %v396_v24 = vadd.s32 %v395_v22, %v393_v23 }
 0x329   :  { %440 = vst.msk [vmem:[%s783_s8] sm:$0xff] %vm439_vm8, %v396_v24 }
 0x32c   :  { %v434_v27 = vpop.xlane.xlu1 %433  ;;  %v406_v28 = vpop.xlane.xlu2 %405 }
 0x32d   :  { %v435_v31 = vcvt.f32.s32 %v434_v27  ;;  %v407_v32 = vcvt.f32.s32 %v406_v28 }
 0x32f   :  { %v438_v33 = vadd.s32 %v437_v30, %v435_v31  ;;  %v410_v34 = vadd.s32 %v409_v29, %v407_v32 }
 0x331   :  { %443 = vst.msk [vmem:[%s783_s8 + $0x18] sm:$0xff] %vm439_vm8, %v438_v33 }
 0x332   :  { %441 = vst.msk [vmem:[%s783_s8 + $0x8] sm:$0xff] %vm439_vm8, %v410_v34 }
 0x333   :  { %668 = dma.done.wait [#allocation4], 512  }
 0x334   :  { %669 = vsyncadd [#allocation4], 4294966784 }
 0x335   :  { %465 = vsyncpa [#allocation3], 1 }
 0x336   :  { %466 = vsyncpa [#allocation6], 1 }
 0x337   :  { %467 = vsyncpa [#allocation4], 1 }

</bundles_post_ra>
